<compile_context>
chip_gen: v5e
topology: v5e:2x2
jax: 0.10.0
libtpu: 0.0.40
codegen_flags: <defaults>
</compile_context>

<pallas_src>
import jax
import jax.numpy as jnp
from jax.experimental import pallas as pl
from jax.experimental.pallas import tpu as pltpu

IN_FEATURES = 7
IN_PAD = 8     # feature (sublane) dim padded 7 -> 8
HID = 32       # common padded width for the packed layer-2..4 slab
NSLAB = 3      # layers 2, 3, 4 live in the packed slab


def _mlp_kernel(x_ref, w1_ref, b1_ref, w_ref, b_ref, o_ref):
    # x_ref : (8,  TB)     input, features on sublanes (row 7 is zero)
    # w1_ref: (32, 8)      layer-1 weight, (out, in) order, in padded 7 -> 8
    # b1_ref: (32, 1)
    # w_ref : (3, 32, 32)  layers 2..4, (out, in), zero-padded to 32x32
    # b_ref : (3, 32, 1)   matching biases, zero-padded
    # o_ref : (2,  TB)     softmax probabilities, classes on sublanes
    x = x_ref[...]

    h = jnp.tanh(jnp.dot(w1_ref[...], x, preferred_element_type=jnp.float32)
                 + b1_ref[...])
    h = jnp.tanh(jnp.dot(w_ref[0], h, preferred_element_type=jnp.float32)
                 + b_ref[0])
    h = jnp.tanh(jnp.dot(w_ref[1], h, preferred_element_type=jnp.float32)
                 + b_ref[1])
    logits = jnp.dot(w_ref[2], h, preferred_element_type=jnp.float32) + b_ref[2]

    # 2-class softmax == sigmoid of logit difference (exact identity):
    #   softmax([l0, l1])[1] = sigmoid(l1 - l0)
    d = logits[1:2, :] - logits[0:1, :]          # (1, TB)
    p1 = 0.5 * (jnp.tanh(0.5 * d) + 1.0)         # sigmoid via EUP tanh
    o_ref[0:1, :] = (1.0 - p1).astype(o_ref.dtype)
    o_ref[1:2, :] = p1.astype(o_ref.dtype)


def _pick_batch_tile(B):
    """Batch tile = lane count of every block.

    Small B -> one full-batch block (lane dim == full array dim is always
    legal).  Larger B -> biggest lane-aligned tile that divides B while still
    giving >= 2 grid steps, so the "parallel" grid axis shards across the two
    TensorCores of a v7x chip.  Awkward B falls back to one full-batch block
    (never a tiny tile)."""
    if B <= 256:
        return B
    for tb in (4096, 2048, 1024, 512, 256, 128):
        if B % tb == 0 and B // tb >= 2:
            return tb
    return B


def mlp_forward(x, w1p, b1p, w_slab, b_slab):
    """x: (B, 7) float32 -> (B, 2) softmax probabilities."""
    B, F = x.shape
    assert F == IN_FEATURES
    # Lane-dense layout: features on sublanes (padded 7 -> 8), batch on lanes.
    x_t = jnp.pad(x.astype(jnp.float32), ((0, 0), (0, IN_PAD - F))).T  # (8, B)

    tb = _pick_batch_tile(B)
    grid = (B // tb,)

    cost = pl.CostEstimate(
        flops=2 * B * (7 * 32 + 32 * 32 + 32 * 16 + 16 * 2),
        transcendentals=B * (32 + 32 + 16 + 1),
        bytes_accessed=4 * (IN_PAD * B + 2 * B
                            + HID * IN_PAD + HID
                            + NSLAB * HID * HID + NSLAB * HID),
    )

    out_t = pl.pallas_call(
        _mlp_kernel,
        out_shape=jax.ShapeDtypeStruct((2, B), jnp.float32),
        grid=grid,
        in_specs=[
            pl.BlockSpec((IN_PAD, tb), lambda i: (0, i)),
            pl.BlockSpec((HID, IN_PAD), lambda i: (0, 0)),
            pl.BlockSpec((HID, 1), lambda i: (0, 0)),
            pl.BlockSpec((NSLAB, HID, HID), lambda i: (0, 0, 0)),
            pl.BlockSpec((NSLAB, HID, 1), lambda i: (0, 0, 0)),
        ],
        out_specs=pl.BlockSpec((2, tb), lambda i: (0, i)),
        compiler_params=pltpu.CompilerParams(
            dimension_semantics=("parallel",)),
        cost_estimate=cost,
    )(x_t, w1p, b1p, w_slab, b_slab)

    return out_t.T  # back to the module's (B, 2) convention


def init_params(key):
    """Deterministic init matching PyTorch Linear conventions: weights are
    (out_features, in_features) with uniform(-1/sqrt(in), 1/sqrt(in)); biases
    (out_features,) with the same bound."""
    dims = [(7, 32), (32, 32), (32, 16), (16, 2)]
    params = []
    for fan_in, fan_out in dims:
        key, kw, kb = jax.random.split(key, 3)
        bound = 1.0 / jnp.sqrt(float(fan_in))
        w = jax.random.uniform(kw, (fan_out, fan_in), jnp.float32, -bound, bound)
        b = jax.random.uniform(kb, (fan_out,), jnp.float32, -bound, bound)
        params.append((w, b))
    return params


def pack_params(params):
    """Pack torch-order (out, in) weights for the kernel:
      * layer 1 kept separate, in-dim zero-padded 7 -> 8 : (32, 8), (32, 1)
      * layers 2..4 zero-padded to 32x32 and stacked     : (3, 32, 32), (3, 32, 1)
    Zero padding is exact: padded weight rows/cols only ever meet zero
    activations/biases, so valid outputs are bit-equivalent to the unpadded math."""
    (w1, b1), (w2, b2), (w3, b3), (w4, b4) = params
    w1p = jnp.zeros((HID, IN_PAD), jnp.float32).at[:, :IN_FEATURES].set(w1)
    b1p = b1.reshape(HID, 1)
    w_slab = jnp.zeros((NSLAB, HID, HID), jnp.float32)
    b_slab = jnp.zeros((NSLAB, HID, 1), jnp.float32)
    for i, (w, b) in enumerate(((w2, b2), (w3, b3), (w4, b4))):
        w_slab = w_slab.at[i, : w.shape[0], : w.shape[1]].set(w)
        b_slab = b_slab.at[i, : b.shape[0], 0].set(b)
    return w1p, b1p, w_slab, b_slab


def reference_forward(x, params):
    """Plain-JAX reference (matches the PyTorch module)."""
    (w1, b1), (w2, b2), (w3, b3), (w4, b4) = params
    h = jnp.tanh(x @ w1.T + b1)
    h = jnp.tanh(h @ w2.T + b2)
    h = jnp.tanh(h @ w3.T + b3)
    return jax.nn.softmax(h @ w4.T + b4, axis=-1)


if __name__ == "__main__":
    key = jax.random.PRNGKey(0)
    key, kx = jax.random.split(key)

    B = 8  # small batch; input feature dim fixed at 7 by the module
    x = jax.random.normal(kx, (B, 7), dtype=jnp.float32)
    params = init_params(key)
    w1p, b1p, w_slab, b_slab = pack_params(params)

    out = mlp_forward(x, w1p, b1p, w_slab, b_slab)
    out = jax.block_until_ready(out)

    ref = reference_forward(x, params)
    assert out.shape == (B, 2)
    assert jnp.allclose(out, ref, atol=1e-5, rtol=1e-5), "mismatch vs reference"
    assert jnp.allclose(jnp.sum(out, axis=-1), jnp.ones((B,)), atol=1e-5)

    print("KERNEL_OK")
</pallas_src>

<mosaic_0001>
module attributes {stable_mosaic.version = 11 : i64} {
  func.func @_mlp_kernel(%arg0: i32, %arg1: memref<8x8xf32, #tpu.memory_space<vmem>>, %arg2: memref<32x8xf32, #tpu.memory_space<vmem>>, %arg3: memref<32x1xf32, #tpu.memory_space<vmem>>, %arg4: memref<3x32x32xf32, #tpu.memory_space<vmem>>, %arg5: memref<3x32x1xf32, #tpu.memory_space<vmem>>, %arg6: memref<2x8xf32, #tpu.memory_space<vmem>>) attributes {dimension_semantics = [#tpu.dimension_semantics<parallel>], iteration_bounds = array<i64: 1>, scalar_prefetch = 0 : i64, scratch_operands = 0 : i64, tpu.core_type = #tpu.core_type<tc>, window_params = [{transform_indices = @transform_0, window_bounds = array<i64: 8, 8>}, {pipeline_mode = #tpu.pipeline_mode<synchronous>, transform_indices = @transform_1, window_bounds = array<i64: 32, 8>}, {pipeline_mode = #tpu.pipeline_mode<synchronous>, transform_indices = @transform_2, window_bounds = array<i64: 32, 1>}, {pipeline_mode = #tpu.pipeline_mode<synchronous>, transform_indices = @transform_3, window_bounds = array<i64: 3, 32, 32>}, {pipeline_mode = #tpu.pipeline_mode<synchronous>, transform_indices = @transform_4, window_bounds = array<i64: 3, 32, 1>}, {transform_indices = @transform_5, window_bounds = array<i64: 2, 8>}]} {
    %c0 = arith.constant 0 : index
    %c0_0 = arith.constant 0 : index
    %0 = vector.load %arg1[%c0, %c0_0] : memref<8x8xf32, #tpu.memory_space<vmem>>, vector<8x8xf32>
    %c0_1 = arith.constant 0 : index
    %c0_2 = arith.constant 0 : index
    %1 = vector.load %arg2[%c0_1, %c0_2] : memref<32x8xf32, #tpu.memory_space<vmem>>, vector<32x8xf32>
    %cst = arith.constant dense<0.000000e+00> : vector<32x8xf32>
    %2 = tpu.matmul %1, %0, %cst {dimension_numbers = #tpu.dot_dimension_numbers<[1], [0], [0], [1], [0, 0, 1, 1], [], []>} : vector<32x8xf32>, vector<8x8xf32>, vector<32x8xf32> -> vector<32x8xf32>
    %c0_3 = arith.constant 0 : index
    %c0_4 = arith.constant 0 : index
    %3 = vector.load %arg3[%c0_3, %c0_4] : memref<32x1xf32, #tpu.memory_space<vmem>>, vector<32x1xf32>
    %4 = vector.broadcast %3 : vector<32x1xf32> to vector<32x8xf32>
    %5 = arith.addf %2, %4 : vector<32x8xf32>
    %6 = math.tanh %5 : vector<32x8xf32>
    %c0_5 = arith.constant 0 : index
    %c0_6 = arith.constant 0 : index
    %c0_7 = arith.constant 0 : index
    %7 = vector.load %arg4[%c0_5, %c0_6, %c0_7] : memref<3x32x32xf32, #tpu.memory_space<vmem>>, vector<1x32x32xf32>
    %8 = vector.shape_cast %7 : vector<1x32x32xf32> to vector<32x32xf32>
    %cst_8 = arith.constant dense<0.000000e+00> : vector<32x8xf32>
    %9 = tpu.matmul %8, %6, %cst_8 {dimension_numbers = #tpu.dot_dimension_numbers<[1], [0], [0], [1], [0, 0, 1, 1], [], []>} : vector<32x32xf32>, vector<32x8xf32>, vector<32x8xf32> -> vector<32x8xf32>
    %c0_9 = arith.constant 0 : index
    %c0_10 = arith.constant 0 : index
    %c0_11 = arith.constant 0 : index
    %10 = vector.load %arg5[%c0_9, %c0_10, %c0_11] : memref<3x32x1xf32, #tpu.memory_space<vmem>>, vector<1x32x1xf32>
    %11 = vector.shape_cast %10 : vector<1x32x1xf32> to vector<32x1xf32>
    %12 = vector.broadcast %11 : vector<32x1xf32> to vector<32x8xf32>
    %13 = arith.addf %9, %12 : vector<32x8xf32>
    %14 = math.tanh %13 : vector<32x8xf32>
    %c1 = arith.constant 1 : index
    %c0_12 = arith.constant 0 : index
    %c0_13 = arith.constant 0 : index
    %15 = vector.load %arg4[%c1, %c0_12, %c0_13] : memref<3x32x32xf32, #tpu.memory_space<vmem>>, vector<1x32x32xf32>
    %16 = vector.shape_cast %15 : vector<1x32x32xf32> to vector<32x32xf32>
    %cst_14 = arith.constant dense<0.000000e+00> : vector<32x8xf32>
    %17 = tpu.matmul %16, %14, %cst_14 {dimension_numbers = #tpu.dot_dimension_numbers<[1], [0], [0], [1], [0, 0, 1, 1], [], []>} : vector<32x32xf32>, vector<32x8xf32>, vector<32x8xf32> -> vector<32x8xf32>
    %c1_15 = arith.constant 1 : index
    %c0_16 = arith.constant 0 : index
    %c0_17 = arith.constant 0 : index
    %18 = vector.load %arg5[%c1_15, %c0_16, %c0_17] : memref<3x32x1xf32, #tpu.memory_space<vmem>>, vector<1x32x1xf32>
    %19 = vector.shape_cast %18 : vector<1x32x1xf32> to vector<32x1xf32>
    %20 = vector.broadcast %19 : vector<32x1xf32> to vector<32x8xf32>
    %21 = arith.addf %17, %20 : vector<32x8xf32>
    %22 = math.tanh %21 : vector<32x8xf32>
    %c2 = arith.constant 2 : index
    %c0_18 = arith.constant 0 : index
    %c0_19 = arith.constant 0 : index
    %23 = vector.load %arg4[%c2, %c0_18, %c0_19] : memref<3x32x32xf32, #tpu.memory_space<vmem>>, vector<1x32x32xf32>
    %24 = vector.shape_cast %23 : vector<1x32x32xf32> to vector<32x32xf32>
    %cst_20 = arith.constant dense<0.000000e+00> : vector<32x8xf32>
    %25 = tpu.matmul %24, %22, %cst_20 {dimension_numbers = #tpu.dot_dimension_numbers<[1], [0], [0], [1], [0, 0, 1, 1], [], []>} : vector<32x32xf32>, vector<32x8xf32>, vector<32x8xf32> -> vector<32x8xf32>
    %c2_21 = arith.constant 2 : index
    %c0_22 = arith.constant 0 : index
    %c0_23 = arith.constant 0 : index
    %26 = vector.load %arg5[%c2_21, %c0_22, %c0_23] : memref<3x32x1xf32, #tpu.memory_space<vmem>>, vector<1x32x1xf32>
    %27 = vector.shape_cast %26 : vector<1x32x1xf32> to vector<32x1xf32>
    %28 = vector.broadcast %27 : vector<32x1xf32> to vector<32x8xf32>
    %29 = arith.addf %25, %28 : vector<32x8xf32>
    %30 = vector.extract_strided_slice %29 {offsets = [1, 0], sizes = [1, 8], strides = [1, 1]} : vector<32x8xf32> to vector<1x8xf32>
    %31 = vector.extract_strided_slice %29 {offsets = [0, 0], sizes = [1, 8], strides = [1, 1]} : vector<32x8xf32> to vector<1x8xf32>
    %32 = arith.subf %30, %31 : vector<1x8xf32>
    %cst_24 = arith.constant 5.000000e-01 : f32
    %33 = vector.broadcast %cst_24 : f32 to vector<1x8xf32>
    %34 = arith.mulf %33, %32 : vector<1x8xf32>
    %35 = math.tanh %34 : vector<1x8xf32>
    %cst_25 = arith.constant 1.000000e+00 : f32
    %36 = vector.broadcast %cst_25 : f32 to vector<1x8xf32>
    %37 = arith.addf %35, %36 : vector<1x8xf32>
    %cst_26 = arith.constant 5.000000e-01 : f32
    %38 = vector.broadcast %cst_26 : f32 to vector<1x8xf32>
    %39 = arith.mulf %38, %37 : vector<1x8xf32>
    %cst_27 = arith.constant 1.000000e+00 : f32
    %40 = vector.broadcast %cst_27 : f32 to vector<1x8xf32>
    %41 = arith.subf %40, %39 : vector<1x8xf32>
    %c0_28 = arith.constant 0 : index
    %c0_29 = arith.constant 0 : index
    %42 = vector.load %arg6[%c0_28, %c0_29] : memref<2x8xf32, #tpu.memory_space<vmem>>, vector<1x8xf32>
    tpu.vector_store %arg6[%c0_28, %c0_29], %41 {strides = array<i32>} : memref<2x8xf32, #tpu.memory_space<vmem>>, vector<1x8xf32>,
    %c1_30 = arith.constant 1 : index
    %c0_31 = arith.constant 0 : index
    %43 = vector.load %arg6[%c1_30, %c0_31] : memref<2x8xf32, #tpu.memory_space<vmem>>, vector<1x8xf32>
    tpu.vector_store %arg6[%c1_30, %c0_31], %39 {strides = array<i32>} : memref<2x8xf32, #tpu.memory_space<vmem>>, vector<1x8xf32>,
    return
  }
  func.func @transform_0(%arg0: i32) -> (i32, i32) {
    %c0_i32 = arith.constant 0 : i32
    %c0_i32_0 = arith.constant 0 : i32
    return %c0_i32, %arg0 : i32, i32
  }
  func.func @transform_1(%arg0: i32) -> (i32, i32) {
    %c0_i32 = arith.constant 0 : i32
    %c0_i32_0 = arith.constant 0 : i32
    %c0_i32_1 = arith.constant 0 : i32
    return %c0_i32, %c0_i32_0 : i32, i32
  }
  func.func @transform_2(%arg0: i32) -> (i32, i32) {
    %c0_i32 = arith.constant 0 : i32
    %c0_i32_0 = arith.constant 0 : i32
    %c0_i32_1 = arith.constant 0 : i32
    return %c0_i32, %c0_i32_0 : i32, i32
  }
  func.func @transform_3(%arg0: i32) -> (i32, i32, i32) {
    %c0_i32 = arith.constant 0 : i32
    %c0_i32_0 = arith.constant 0 : i32
    %c0_i32_1 = arith.constant 0 : i32
    %c0_i32_2 = arith.constant 0 : i32
    return %c0_i32, %c0_i32_0, %c0_i32_1 : i32, i32, i32
  }
  func.func @transform_4(%arg0: i32) -> (i32, i32, i32) {
    %c0_i32 = arith.constant 0 : i32
    %c0_i32_0 = arith.constant 0 : i32
    %c0_i32_1 = arith.constant 0 : i32
    %c0_i32_2 = arith.constant 0 : i32
    return %c0_i32, %c0_i32_0, %c0_i32_1 : i32, i32, i32
  }
  func.func @transform_5(%arg0: i32) -> (i32, i32) {
    %c0_i32 = arith.constant 0 : i32
    %c0_i32_0 = arith.constant 0 : i32
    return %c0_i32, %arg0 : i32, i32
  }
}

</mosaic_0001>

<bundles_post_ra>
// kernel: tpu_custom_call.1
= control target key start
LH: loop header
LB: loop body
LE: loop exit
PB: predicated region body
PF: predicated region fallthrough
CT: control target
= control target key end

     0   :  { %vm50_vm0 = vcmask 64512   ;;  %v427_v3 = vmov 0   ;;  %s568_s0 = inlined_call_operand.vmem [shape: f32[8,8], index: 0, kind: input, shape index: {}]   ;;  %s569_s1 = inlined_call_operand.vmem [shape: f32[32,8], index: 1, kind: input, shape index: {}]   ;;  %s570_s2 = inlined_call_operand.vmem [shape: f32[32,1], index: 2, kind: input, shape index: {}]   ;;  %s571_s3 = inlined_call_operand.vmem [shape: f32[3,32,32], index: 3, kind: input, shape index: {}]   ;;  %s572_s4 = inlined_call_operand.vmem [shape: f32[3,32,1], index: 4, kind: input, shape index: {}]   ;;  %s573_s5 = inlined_call_operand.hbm [shape: f32[2,8], index: 5, kind: output, shape index: {}]  }
   0x1   :  { %v21_v0 = vld [vmem:[%s568_s0] sm:$0xff]  ;;  %v29_v1 = vld [vmem:[%s570_s2 + $0x18] sm:$0xff]  ;;  %372 = vset.pattern.permute.xlu0 %v427_v3  ;;  %v27_v4 = vld [vmem:[%s570_s2 + $0x8] sm:$0xff]  ;;  %373 = vset.pattern.permute.xlu1 %v427_v3 }
   0x2   :  { %v22_v2 = vld [vmem:[%s569_s1] sm:$0xff]  ;;  %78 = vmatpush.msra.mxu0 %v21_v0  ;;  %47 = vperm.xlu0 %372, %v29_v1  }
   0x3   :  { %338 = vmatmul.msk.f32.vlgmr.msra.gmra.mxu0 %vm50_vm0, %v22_v2  ;;  %374 = vset.pattern.permute.xlu2 %v427_v3 }
   0x4   :  { %37 = vperm.xlu1 %373, %v27_v4  }
   0x5   :  { %10 = vsyncpa [#allocation3], 0  ;;  %v28_v5 = vld [vmem:[%s570_s2 + $0x10] sm:$0xff]  ;;  %v23_v6 = vld [vmem:[%s569_s1 + $0x8] sm:$0xff]  ;;  %vm124_vm1 = vcmask 261120   ;;  %vm319_vm2 = vcmask 58369  }
   0x6   :  { %v26_v7 = vld [vmem:[%s570_s2] sm:$0xff]  ;;  %v101_v8 = vld [vmem:[%s572_s4 + $0x8] sm:$0xff]  ;;  %v24_v9 = vld [vmem:[%s569_s1 + $0x10] sm:$0xff]  ;;  %s428_s21 = smov [#allocation2]  }
   0x7   :  { %v100_v10 = vld [vmem:[%s572_s4] sm:$0xff]  ;;  %v352_v11 = vld [vmem:[%s572_s4 + $0x30] sm:$0xff]  ;;  %v25_v12 = vld [vmem:[%s569_s1 + $0x18] sm:$0xff]  ;;  %s327_s22 = sshll.u32 %s428_s21, 4  ;;  %s328_s22 = int_to_ptr.vmem [resolvable:$true] %s327_s22 }
   0x8   :  { %v351_v13 = vld [vmem:[%s572_s4 + $0x28] sm:$0xff]  ;;  %v362_v14 = vld [vmem:[%s572_s4 + $0x40] sm:$0xff]  ;;  %v103_v28 = vld [vmem:[%s572_s4 + $0x18] sm:$0xff] }
   0x9   :  { %121 = vperm.xlu2 %374, %v103_v28   ;;  %v96_v31 = vld [vmem:[%s571_s3] sm:$0xff]  ;;  %v102_v33 = vld [vmem:[%s572_s4 + $0x10] sm:$0xff]  ;;  %v97_v34 = vld [vmem:[%s571_s3 + $0x8] sm:$0xff] }
   0xa   :  { %42 = vperm.xlu0 %372, %v28_v5   ;;  %v353_v35 = vld [vmem:[%s572_s4 + $0x38] sm:$0xff]  ;;  %v98_v36 = vld [vmem:[%s571_s3 + $0x10] sm:$0xff]  ;;  %v350_v37 = vld [vmem:[%s572_s4 + $0x20] sm:$0xff] }
   0xb   :  { %339 = vmatmul.msk.f32.gmra.mxu0 %vm50_vm0, %v23_v6  ;;  %v99_v38 = vld [vmem:[%s571_s3 + $0x18] sm:$0xff]  ;;  %v346_v54 = vld [vmem:[%s571_s3 + $0x20] sm:$0xff]  ;;  %v347_v56 = vld [vmem:[%s571_s3 + $0x28] sm:$0xff] }
   0xc   :  { %32 = vperm.xlu1 %373, %v26_v7   ;;  %v348_v57 = vld [vmem:[%s571_s3 + $0x30] sm:$0xff]  ;;  %v349_v58 = vld [vmem:[%s571_s3 + $0x38] sm:$0xff] }
  0x11   :  { %116 = vperm.xlu2 %374, %v102_v33  }
  0x12   :  { %111 = vperm.xlu0 %372, %v101_v8  }
  0x13   :  { %340 = vmatmul.msk.f32.gmra.mxu0 %vm50_vm0, %v24_v9 }
  0x14   :  { %106 = vperm.xlu1 %373, %v100_v10   ;;  %v358_v10 = vld [vmem:[%s571_s3 + $0x40] sm:$0xff] }
  0x19   :  { %197 = vperm.xlu2 %374, %v353_v35  }
  0x1a   :  { %192 = vperm.xlu0 %372, %v352_v11  }
  0x1b   :  { %341 = vmatmul.msk.f32.gmra.mxu0 %vm50_vm0, %v25_v12  ;;  %v359_v12 = vld [vmem:[%s571_s3 + $0x48] sm:$0xff] }
  0x1c   :  { %187 = vperm.xlu1 %373, %v351_v13   ;;  %v360_v13 = vld [vmem:[%s571_s3 + $0x50] sm:$0xff] }
  0x21   :  { %182 = vperm.xlu2 %374, %v350_v37  }
  0x22   :  { %257 = vperm.xlu0 %372, %v362_v14   ;;  %v361_v14 = vld [vmem:[%s571_s3 + $0x58] sm:$0xff]  ;;  %s329_s3 = sshll.u32 %s573_s5, 4  ;;  %s330_s3 = int_to_ptr.hbm [resolvable:$true] %s329_s3 }
  0x63   :  { %v122_v41 = vpop.permute.xlu2 %121 }
  0x6b   :  { %v117_v43 = vpop.permute.xlu2 %116 }
  0x73   :  { %v198_v62 = vpop.permute.xlu2 %197 }
  0x74   :  { %v48_v17 = vpop.permute.xlu0 %47 }
  0x76   :  { %v38_v18 = vpop.permute.xlu1 %37 }
  0x7b   :  { %v183_v5 = vpop.permute.xlu2 %182 }
  0x7c   :  { %v43_v20 = vpop.permute.xlu0 %42 }
  0x7e   :  { %v33_v24 = vpop.permute.xlu1 %32 }
  0x80   :  { %v80_v15 = vpop.f32.mrf.mxu0 }
  0x81   :  { %v81_v26 = vadd.f32 %v80_v15, %v33_v24 }
  0x84   :  { %v112_v47 = vpop.permute.xlu0 %111 }
  0x86   :  { %v107_v49 = vpop.permute.xlu1 %106 }
  0x88   :  { %v83_v16 = vpop.f32.mrf.mxu0 }
  0x89   :  { %v84_v25 = vadd.f32 %v83_v16, %v38_v18 }
  0x8c   :  { %v193_v63 = vpop.permute.xlu0 %192 }
  0x8e   :  { %v188_v3 = vpop.permute.xlu1 %187 }
  0x90   :  { %v86_v19 = vpop.f32.mrf.mxu0 }
  0x91   :  { %v87_v22 = vadd.f32 %v86_v19, %v43_v20 }
  0x94   :  { %v258_v15 = vpop.permute.xlu0 %257 }
  0x98   :  { %v89_v21 = vpop.f32.mrf.mxu0 }
  0x99   :  { %v90_v23 = vadd.f32 %v89_v21, %v48_v17 }
  0x9b   :  { %375 = vtanh.f32 %v90_v23 }
  0x9c   :  { %377 = vtanh.f32 %v87_v22 }
  0x9d   :  { %379 = vtanh.f32 %v84_v25 }
  0x9e   :  { %381 = vtanh.f32 %v81_v26 }
  0xa1   :  { %v376_v27 = vpop.eup %375 }
  0xa2   :  { %149 = vmatpush.msra.mxu1 %v376_v27  ;;  %v378_v29 = vpop.eup %377 }
  0xa3   :  { %v380_v30 = vpop.eup %379 }
  0xa4   :  { %150 = vmatpush.msra.mxu1 %v378_v29  ;;  %v382_v32 = vpop.eup %381 }
  0xa6   :  { %151 = vmatpush.msra.mxu1 %v380_v30 }
  0xa8   :  { %152 = vmatpush.msra.mxu1 %v382_v32 }
  0xa9   :  { %342 = vmatmul.msk.f32.vlgmr.msra.gmra.mxu1 %vm124_vm1, %v96_v31 }
  0xb1   :  { %343 = vmatmul.msk.f32.gmra.mxu1 %vm124_vm1, %v97_v34 }
  0xb9   :  { %344 = vmatmul.msk.f32.gmra.mxu1 %vm124_vm1, %v98_v36 }
  0xc1   :  { %345 = vmatmul.msk.f32.gmra.mxu1 %vm124_vm1, %v99_v38 }
 0x126   :  { %v154_v39 = vpop.f32.mrf.mxu1 }
 0x127   :  { %v155_v50 = vadd.f32 %v154_v39, %v107_v49 }
 0x12e   :  { %v157_v40 = vpop.f32.mrf.mxu1 }
 0x12f   :  { %v158_v48 = vadd.f32 %v157_v40, %v112_v47 }
 0x136   :  { %v160_v42 = vpop.f32.mrf.mxu1 }
 0x137   :  { %v161_v45 = vadd.f32 %v160_v42, %v117_v43 }
 0x13e   :  { %v163_v44 = vpop.f32.mrf.mxu1 }
 0x13f   :  { %v164_v46 = vadd.f32 %v163_v44, %v122_v41 }
 0x141   :  { %383 = vtanh.f32 %v164_v46 }
 0x142   :  { %385 = vtanh.f32 %v161_v45 }
 0x143   :  { %387 = vtanh.f32 %v158_v48 }
 0x144   :  { %389 = vtanh.f32 %v155_v50 }
 0x147   :  { %v384_v51 = vpop.eup %383 }
 0x148   :  { %224 = vmatpush.msra.mxu2 %v384_v51  ;;  %v386_v52 = vpop.eup %385 }
 0x149   :  { %v388_v53 = vpop.eup %387 }
 0x14a   :  { %225 = vmatpush.msra.mxu2 %v386_v52  ;;  %v390_v55 = vpop.eup %389 }
 0x14c   :  { %226 = vmatpush.msra.mxu2 %v388_v53 }
 0x14e   :  { %227 = vmatpush.msra.mxu2 %v390_v55 }
 0x14f   :  { %354 = vmatmul.msk.f32.vlgmr.msra.gmra.mxu2 %vm124_vm1, %v346_v54 }
 0x157   :  { %355 = vmatmul.msk.f32.gmra.mxu2 %vm124_vm1, %v347_v56 }
 0x15f   :  { %356 = vmatmul.msk.f32.gmra.mxu2 %vm124_vm1, %v348_v57 }
 0x167   :  { %357 = vmatmul.msk.f32.gmra.mxu2 %vm124_vm1, %v349_v58 }
 0x1d2   :  { %v229_v59 = vpop.f32.mrf.mxu2 }
 0x1d3   :  { %v230_v6 = vadd.f32 %v229_v59, %v183_v5 }
 0x1da   :  { %v232_v60 = vpop.f32.mrf.mxu2 }
 0x1db   :  { %v233_v4 = vadd.f32 %v232_v60, %v188_v3 }
 0x1e2   :  { %v235_v61 = vpop.f32.mrf.mxu2 }
 0x1e3   :  { %v236_v1 = vadd.f32 %v235_v61, %v193_v63 }
 0x1ea   :  { %v238_v0 = vpop.f32.mrf.mxu2 }
 0x1eb   :  { %v239_v2 = vadd.f32 %v238_v0, %v198_v62 }
 0x1ed   :  { %391 = vtanh.f32 %v239_v2 }
 0x1ee   :  { %393 = vtanh.f32 %v236_v1 }
 0x1ef   :  { %395 = vtanh.f32 %v233_v4 }
 0x1f0   :  { %397 = vtanh.f32 %v230_v6 }
 0x1f3   :  { %v392_v7 = vpop.eup %391 }
 0x1f4   :  { %296 = vmatpush.msra.mxu3 %v392_v7  ;;  %v394_v8 = vpop.eup %393 }
 0x1f5   :  { %v396_v9 = vpop.eup %395 }
 0x1f6   :  { %297 = vmatpush.msra.mxu3 %v394_v8  ;;  %v398_v11 = vpop.eup %397 }
 0x1f8   :  { %298 = vmatpush.msra.mxu3 %v396_v9 }
 0x1fa   :  { %299 = vmatpush.msra.mxu3 %v398_v11 }
 0x1fb   :  { %366 = vmatmul.msk.f32.vlgmr.msra.gmra.mxu3 %vm124_vm1, %v358_v10 }
 0x203   :  { %367 = vmatmul.msk.f32.gmra.mxu3 %vm124_vm1, %v359_v12 }
 0x20b   :  { %368 = vmatmul.msk.f32.gmra.mxu3 %vm124_vm1, %v360_v13 }
 0x213   :  { %369 = vmatmul.msk.f32.gmra.mxu3 %vm124_vm1, %v361_v14 }
 0x27e   :  { %v301_v16 = vpop.f32.mrf.mxu3 }
 0x27f   :  { %v302_v17 = vadd.f32 %v301_v16, %v258_v15 }
 0x281   :  { %v311_v18 = vrot.slane %v302_v17, 7 }
 0x283   :  { %v313_v19 = vsub.f32 %v302_v17, %v311_v18 }
 0x285   :  { %v314_v20 = vmul.f32 0.5, %v313_v19 }
 0x286   :  { %v304_v21 = vpop.f32.mrf.mxu3 }
 0x287   :  { %399 = vtanh.f32 %v314_v20 }
 0x28d   :  { %v400_v22 = vpop.eup %399 }
 0x28e   :  { %v316_v23 = vadd.f32 1.0, %v400_v22  ;;  %v306_v24 = vpop.f32.mrf.mxu3 }
 0x290   :  { %v317_v25 = vmul.f32 0.5, %v316_v23 }
 0x292   :  { %v318_v26 = vsub.f32 1.0, %v317_v25  ;;  %321 = vst.msk [vmem:[#allocation2] sm:$0x2] %vm319_vm2, %v317_v25 }
 0x294   :  { %320 = vst.msk [vmem:[#allocation2 - $0x1] sm:$0x2] %vm319_vm2, %v318_v26 }
 0x295   :  { %332 = dma.vmem_to_hbm [thread:$0]  %s328_s22, 32, %s330_s3, [#allocation3]  }
 0x296   :  { %v308_v27 = vpop.f32.mrf.mxu3 }
 0x297   :  { %425 = dma.done.wait [#allocation3], 32  }
 0x298   :  { %426 = vsyncadd [#allocation3], 4294967264 }
 0x299   :  { %337 = vsyncpa [#allocation3], 1 }

</bundles_post_ra>
